<compile_context>
chip_gen: v7x
topology: tpu7x:2x2x1
jax: 0.10.0
libtpu: 0.0.40
codegen_flags: <defaults>
</compile_context>

<pallas_src>
import functools

import jax
import jax.numpy as jnp
from jax.experimental import pallas as pl
from jax.experimental.pallas import tpu as pltpu


_LANE = 128
_VMEM_LIMIT_BYTES = 32 * 1024 * 1024      # safe scoped-VMEM request on v5e/v6e/v7x
_A_RESIDENT_BUDGET = 1 * 1024 * 1024      # hold `a` fully in VMEM only below this


def _cdiv(a, b):
    return -(-a // b)


def _round_up(a, b):
    return _cdiv(a, b) * b


def _sublane_pack(dtype) -> int:
    """Rows per packed sublane group (8 f32, 16 bf16, 32 int8/fp8)."""
    itemsize = jnp.dtype(dtype).itemsize
    return max(8, 32 // max(itemsize, 1))


def _tile_target_bytes() -> int:
    """Per-x-tile byte budget, scaled with the generation's HBM bandwidth."""
    try:
        kind = jax.devices()[0].device_kind.lower()
    except Exception:
        kind = ""
    if "v7" in kind or "7x" in kind:
        return 6 * 1024 * 1024            # ~3.2 TB/s/TC: big tiles amortize step cost
    if "v6" in kind or "trillium" in kind:
        return 4 * 1024 * 1024            # 4x4 MiB double-buffered fits 32 MiB scoped
    return 2 * 1024 * 1024                # v5e/v5p/v4/unknown: conservative default


def _choose_tiles(nc, hw, itemsize, pack, target):
    """Pick (TM, TN) ~ target bytes per x tile, sublane/lane aligned, no wrapper pad."""
    # Lane (last) dim: keep full H*W when one pack-row stripe fits the budget; otherwise
    # split into 128-multiples (HW need NOT divide TN -- last column block is masked).
    if pack * hw * itemsize > target and hw > _LANE:
        tn = (target // (pack * itemsize)) // _LANE * _LANE
        tn = max(_LANE, min(tn, _round_up(hw, _LANE)))
    else:
        tn = hw
    # Sublane (row) dim: as many pack-multiples as fit the budget.
    tm = max(pack, (target // (tn * itemsize)) // pack * pack)
    tm = min(tm, _round_up(nc, pack))
    # Keep >= 2 blocks on a "parallel" axis when there is splittable work so v7x's two
    # TensorCores both get a share (harmless on single-TC v5e/v6e).
    if _cdiv(nc, tm) * _cdiv(hw, tn) < 2 and nc > pack:
        tm = max(pack, _round_up(_cdiv(nc, 2), pack))
    return tm, tn


def _kernel_a_resident(a_ref, x_ref, o_ref, *, tm):
    # a_ref: full (rows_padded, 1) array resident in VMEM; x_ref/o_ref: (TM, TN) tiles.
    row0 = pl.multiple_of(pl.program_id(0) * tm, tm)
    o_ref[...] = x_ref[...] + a_ref[pl.ds(row0, tm), :]


def _kernel_a_tiled(a_ref, x_ref, o_ref):
    # a_ref: (TM, 1) block; broadcast-add along the lane axis on the VPU.
    o_ref[...] = x_ref[...] + a_ref[...]


def shift_channel(x, a, *, donate_x: bool = False):
    """a.expand_as(x) + x for x in NCHW, a broadcastable to (N, C, 1, 1)."""
    N, C, H, W = x.shape
    dtype = x.dtype
    itemsize = jnp.dtype(dtype).itemsize

    NC, HW = N * C, H * W
    pack = _sublane_pack(dtype)
    TM, TN = _choose_tiles(NC, HW, itemsize, pack, _tile_target_bytes())
    grid = (_cdiv(NC, TM), _cdiv(HW, TN))

    x2 = x.reshape(NC, HW)
    a2 = jnp.broadcast_to(a, (N, C, 1, 1)).astype(dtype).reshape(NC, 1)

    # Hold `a` fully resident in VMEM (one DMA, sliced in-kernel) when its lane-padded
    # footprint is small; otherwise stream per-tile (TM, 1) blocks.
    rows_padded = grid[0] * TM
    a_resident = rows_padded * _LANE * itemsize <= _A_RESIDENT_BUDGET
    if a_resident:
        if rows_padded != NC:
            # Tiny pad (NC scalars) so the in-kernel pl.ds slice never goes OOB.
            a2 = jnp.pad(a2, ((0, rows_padded - NC), (0, 0)))
        a_spec = pl.BlockSpec(memory_space=pltpu.MemorySpace.VMEM)
        kernel = functools.partial(_kernel_a_resident, tm=TM)
    else:
        a_spec = pl.BlockSpec((TM, 1), lambda i, j: (i, 0))
        kernel = _kernel_a_tiled

    kwargs = {}
    if donate_x:
        # Inputs are (a2, x2): alias x2 (index 1) onto output 0.  With the wrapper pad
        # removed the alias now really targets the caller's buffer.
        kwargs["input_output_aliases"] = {1: 0}

    out2 = pl.pallas_call(
        kernel,
        out_shape=jax.ShapeDtypeStruct((NC, HW), dtype),
        grid=grid,
        in_specs=[
            a_spec,                                         # per-row scalar
            pl.BlockSpec((TM, TN), lambda i, j: (i, j)),    # x tile
        ],
        out_specs=pl.BlockSpec((TM, TN), lambda i, j: (i, j)),
        compiler_params=pltpu.CompilerParams(
            dimension_semantics=("parallel", "parallel"),
            vmem_limit_bytes=_VMEM_LIMIT_BYTES,
        ),
        cost_estimate=pl.CostEstimate(
            flops=NC * HW,
            transcendentals=0,
            bytes_accessed=(2 * NC * HW + NC) * itemsize,
        ),
        **kwargs,
    )(a2, x2)

    return out2.reshape(N, C, H, W)


class ShiftChannel:
    """Mirror of the PyTorch module interface."""

    def __init__(self, layers):
        self.layers = layers

    def __call__(self, x, outputs):
        a = outputs[self.layers[0]]
        return shift_channel(x, a)


if __name__ == "__main__":
    key = jax.random.PRNGKey(0)
    k1, k2, k3, k4 = jax.random.split(key, 4)

    # Case 1: aligned shapes (N*C multiple of 8, H*W multiple of 128).
    N, C, H, W = 2, 4, 16, 16
    x = jax.random.normal(k1, (N, C, H, W), dtype=jnp.float32)
    a = jax.random.normal(k2, (N, C, 1, 1), dtype=jnp.float32)
    outputs = [a]

    mod = ShiftChannel(layers=[0])
    out = jax.block_until_ready(mod(x, outputs))
    ref = jnp.broadcast_to(a, x.shape) + x
    assert out.shape == x.shape
    assert jnp.allclose(out, ref, atol=1e-6), "mismatch vs reference (aligned case)"

    # Case 2: ragged shapes (N*C=6 handled by masked partial row block; H*W=49
    # kept full-extent on the lane axis) -- no wrapper pad / slice any more.
    N2, C2, H2, W2 = 2, 3, 7, 7
    x2 = jax.random.normal(k3, (N2, C2, H2, W2), dtype=jnp.float32)
    a2 = jax.random.normal(k4, (N2, C2, 1, 1), dtype=jnp.float32)
    out2 = jax.block_until_ready(shift_channel(x2, a2))
    ref2 = jnp.broadcast_to(a2, x2.shape) + x2
    assert out2.shape == x2.shape
    assert jnp.allclose(out2, ref2, atol=1e-6), "mismatch vs reference (ragged case)"

    print("KERNEL_OK")
</pallas_src>

<mosaic_0001>
module attributes {stable_mosaic.version = 11 : i64} {
  func.func @_kernel_a_resident(%arg0: i32, %arg1: i32, %arg2: memref<8x1xf32, #tpu.memory_space<vmem>>, %arg3: memref<8x256xf32, #tpu.memory_space<vmem>>, %arg4: memref<8x256xf32, #tpu.memory_space<vmem>>) attributes {dimension_semantics = [#tpu.dimension_semantics<parallel>, #tpu.dimension_semantics<parallel>], iteration_bounds = array<i64: 1, 1>, scalar_prefetch = 0 : i64, scratch_operands = 0 : i64, tpu.core_type = #tpu.core_type<tc>, window_params = [{pipeline_mode = #tpu.pipeline_mode<synchronous>, transform_indices = @transform_0, window_bounds = array<i64: 8, 1>}, {transform_indices = @transform_1, window_bounds = array<i64: 8, 256>}, {transform_indices = @transform_2, window_bounds = array<i64: 8, 256>}]} {
    %c8_i32 = arith.constant 8 : i32
    %0 = arith.muli %arg0, %c8_i32 : i32
    %1 = tpu.assume_multiple %0, 8 : i32
    %c0 = arith.constant 0 : index
    %c0_0 = arith.constant 0 : index
    %2 = vector.load %arg3[%c0, %c0_0] : memref<8x256xf32, #tpu.memory_space<vmem>>, vector<8x256xf32>
    %3 = arith.index_cast %1 : i32 to index
    %c0_1 = arith.constant 0 : index
    %4 = vector.load %arg2[%3, %c0_1] : memref<8x1xf32, #tpu.memory_space<vmem>>, vector<8x1xf32>
    %5 = vector.broadcast %4 : vector<8x1xf32> to vector<8x256xf32>
    %6 = arith.addf %2, %5 : vector<8x256xf32>
    %c0_2 = arith.constant 0 : index
    %c0_3 = arith.constant 0 : index
    %7 = vector.load %arg4[%c0_2, %c0_3] : memref<8x256xf32, #tpu.memory_space<vmem>>, vector<8x256xf32>
    tpu.vector_store %arg4[%c0_2, %c0_3], %6 {strides = array<i32>} : memref<8x256xf32, #tpu.memory_space<vmem>>, vector<8x256xf32>,
    return
  }
  func.func @transform_0(%arg0: i32, %arg1: i32) -> (i32, i32) {
    %c0_i32 = arith.constant 0 : i32
    %c0_i32_0 = arith.constant 0 : i32
    %c0_i32_1 = arith.constant 0 : i32
    return %c0_i32, %c0_i32_0 : i32, i32
  }
  func.func @transform_1(%arg0: i32, %arg1: i32) -> (i32, i32) {
    %c0_i32 = arith.constant 0 : i32
    return %arg0, %arg1 : i32, i32
  }
  func.func @transform_2(%arg0: i32, %arg1: i32) -> (i32, i32) {
    %c0_i32 = arith.constant 0 : i32
    return %arg0, %arg1 : i32, i32
  }
}

</mosaic_0001>

<bundles_post_ra>
// kernel: tpu_custom_call.1
= control target key start
LH: loop header
LB: loop body
LE: loop exit
PB: predicated region body
PF: predicated region fallthrough
CT: control target
= control target key end

     0   :  { %7 = vsyncpa [#allocation3], 0  ;;  %s150_s0 = inlined_call_operand.vmem [shape: f32[8,1], index: 0, kind: input, shape index: {}]   ;;  %s151_s1 = inlined_call_operand.hbm [shape: f32[8,256], index: 1, kind: input, shape index: {}]   ;;  %s152_s2 = inlined_call_operand.hbm [shape: f32[8,256], index: 2, kind: output, shape index: {}]  }
   0x1   :  { %8 = vsyncpa [#allocation4], 0  ;;  %s105_s9 = smov [#allocation2]   ;;  %s57_s13 = scalar_lea.hbm %s151_s1, 256 }
   0x2   :  { %s17_s10 = sshll.u32 %s105_s9, 4  ;;  %p58_p0 = scmp.ne.s32.totalorder %s151_s1, %s57_s13  ;;  %s18_s10 = int_to_ptr.vmem [resolvable:$true] %s17_s10 }
   0x3   :  { %p61_p1 = scmp.lt.u32.totalorder %s57_s13, %s151_s1 }
   0x5   :  { %p63_p2 = pnand %p61_p1, %p58_p0 }
   0x7   :  { %66 = shalt.err (!%p63_p2)
}
   0x8   :  { %s67_s18 = scalar_lea.vmem %s18_s10, 256  ;;  %p72_p4 = scmp.lt.s32.totalorder %s18_s10, %s18_s10 }
   0x9   :  { %p68_p3 = scmp.ne.s32.totalorder %s18_s10, %s67_s18  ;;  %p73_p5 = scmp.lt.s32.totalorder %s67_s18, %s67_s18 }
   0xb   :  { %p74_p6 = por %p73_p5, %p72_p4 }
   0xd   :  { %p75_p7 = pnand %p74_p6, %p68_p3 }
   0xf   :  { %78 = shalt.err (!%p75_p7)
}
  0x10   :  { %20 = dma.hbm_to_vmem [thread:$0]  %s151_s1, 256, %s18_s10, [#allocation3]  }
  0x11   :  { %101 = dma.done.wait [#allocation3], 256  }
  0x12   :  { %102 = vsyncadd [#allocation3], 4294967040  ;;  %v106_v0 = vmov 0   ;;  %v28_v1 = vld [vmem:[%s150_s0] sm:$0xff]  ;;  %v26_v3 = vld [vmem:[#allocation2 + $0x8] sm:$0xff]  ;;  %s107_s23 = smov [#allocation5]  }
  0x13   :  { %56 = vset.pattern.permute.xlu0 %v106_v0  ;;  %v25_v2 = vld [vmem:[#allocation2] sm:$0xff]  ;;  %s44_s24 = sshll.u32 %s107_s23, 4  ;;  %s45_s24 = int_to_ptr.vmem [resolvable:$true] %s44_s24 }
  0x14   :  { %31 = vperm.xlu0 %56, %v28_v1   ;;  %s79_s1 = scalar_lea.vmem %s45_s24, 256  ;;  %p84_p9 = scmp.lt.s32.totalorder %s45_s24, %s45_s24 }
  0x15   :  { %p80_p8 = scmp.ne.s32.totalorder %s45_s24, %s79_s1  ;;  %p85_p10 = scmp.lt.s32.totalorder %s79_s1, %s79_s1 }
  0x17   :  { %p86_p11 = por %p85_p10, %p84_p9 }
  0x19   :  { %p87_p12 = pnand %p86_p11, %p80_p8 }
  0x93   :  { %v32_v4 = vpop.permute.xlu0 %31 }
  0x94   :  { %v34_v5 = vadd.f32 %v32_v4, %v25_v2  ;;  %v35_v6 = vadd.f32 %v32_v4, %v26_v3 }
  0x96   :  { %36 = vst [vmem:[#allocation5] sm:$0xff] %v34_v5  ;;  %37 = vst [vmem:[#allocation5 + $0x8] sm:$0xff] %v35_v6 }
  0x97   :  { %90 = shalt.err (!%p87_p12)
}
  0x98   :  { %s91_s26 = scalar_lea.hbm %s152_s2, 256 }
  0x99   :  { %p92_p13 = scmp.ne.s32.totalorder %s152_s2, %s91_s26  ;;  %p95_p0 = scmp.lt.u32.totalorder %s91_s26, %s152_s2 }
  0x9b   :  { %p97_p1 = pnand %p95_p0, %p92_p13 }
  0x9d   :  { %100 = shalt.err (!%p97_p1)
}
  0x9e   :  { %47 = dma.vmem_to_hbm [thread:$0]  %s45_s24, 256, %s152_s2, [#allocation4]  }
  0x9f   :  { %103 = dma.done.wait [#allocation4], 256  }
  0xa0   :  { %104 = vsyncadd [#allocation4], 4294967040 }
  0xa1   :  { %51 = vsyncpa [#allocation3], 1 }
  0xa2   :  { %52 = vsyncpa [#allocation4], 1 }

</bundles_post_ra>
